<compile_context>
chip_gen: v7x
topology: tpu7x:2x2x1
jax: 0.10.0
libtpu: 0.0.40
codegen_flags: <defaults>
</compile_context>

<pallas_src>
import jax
import jax.numpy as jnp
from jax.experimental import pallas as pl
from jax.experimental.pallas import tpu as pltpu


def _lin_unknown_var_kernel(x_ref, v_ref, lam_ref, b_ref, o_ref):
    # lambda_ is a 1x1 matrix, so inverse == scalar reciprocal. SMEM scalar read,
    # hoisted once per tile (no per-step VMEM (1,1) tiles to DMA).
    var = 1.0 / lam_ref[0, 0]
    w_row = v_ref[...] * var                                   # (1, D) VPU scale, lane-dense
    # GEMV as a VPU multiply + lane (XLU) reduction instead of an (N,D)x(D,1) MXU
    # matmul: streams x at full lane width and keeps the MXU off the critical path.
    acc = jnp.sum(x_ref[...] * w_row, axis=-1, keepdims=True)  # (TILE_N, 1) f32
    o_ref[...] = (acc + b_ref[0, 0] * var).astype(o_ref.dtype)


def _round_up(a, b):
    return ((a + b - 1) // b) * b


def _tpu_generation():
    try:
        kind = jax.devices()[0].device_kind.lower()
    except Exception:
        return "unknown"
    if "v7" in kind or "7x" in kind:
        return "v7x"
    if "v6" in kind:
        return "v6e"
    if "v5" in kind:
        return "v5e"
    return "unknown"


def _gen_budget():
    """(byte budget for the kernel's double-buffered tiles, vmem_limit_bytes or None)."""
    gen = _tpu_generation()
    if gen == "v7x":
        # 64 MiB physical / 32 MiB default scoped per TC: big tiles, raised limit.
        return 40 * 1024 * 1024, 48 * 1024 * 1024
    if gen == "v6e":
        # 32 MiB default scoped VMEM: fits without raising the limit.
        return 24 * 1024 * 1024, None
    # v5e (16 MiB default scoped) or unknown backend: conservative; at 0.82 TB/s
    # a ~4-6 MiB x slab already keeps per-step overhead < ~7%.
    return 12 * 1024 * 1024, None


def _num_parallel_cores():
    # v7x has 2 TensorCores per chip sharing the "parallel" grid axis.
    return 2 if _tpu_generation() == "v7x" else 1


def _pick_tile_n(n, d, itemsize):
    """Largest N tile (multiple of 8) whose double-buffered x tile plus the
    lane-padded output column fit the per-generation VMEM budget, while keeping
    at least 2 grid steps per TensorCore so the pipeline / megacore split stay
    populated."""
    budget, _ = _gen_budget()
    d_lanes = _round_up(d, 128)                      # real VMEM width of an x row
    # Per row: 2 x-buffers (d_lanes wide) + 2 output buffers (column padded to 128 lanes).
    per_row_bytes = 2 * (d_lanes + 128) * itemsize
    rows = max(8, budget // per_row_bytes)
    rows = (rows // 8) * 8
    # Keep >= 2 steps per core so v7x's two TCs both get work and the DMA
    # prologue stays hidden.
    min_steps = 2 * _num_parallel_cores()
    rows = min(rows, max(8, _round_up(pl.cdiv(n, min_steps), 8)))
    # Don't make the tile bigger than the (8-aligned) problem itself.
    rows = min(rows, _round_up(n, 8))
    return max(8, rows)


def linear_unknown_variance(x, v, lambda_, bias, *, tile_n=None):
    """Forward pass of LinearUnknownVariance as a single Pallas TPU kernel.

    x:       [N, D] float32
    v:       [D, 1] float32  (empirical weight * lambda_)
    lambda_: [1, 1] float32  (1 / empirical variance)
    bias:    [1, 1] float32  (empirical bias * lambda_)
    returns: [N, 1] float32

    Note: lambda_ == 0 produces inf/nan via 1/lambda_ (PyTorch's .inverse()
    would raise instead).
    """
    n, d = x.shape
    if tile_n is None:
        tile_n = _pick_tile_n(n, d, x.dtype.itemsize)

    v_row = v.reshape(1, d)                # lane-dense weight row, VMEM-resident
    grid = (pl.cdiv(n, tile_n),)           # ragged last block: OOB-masked, no pad copy
    _, vmem_limit = _gen_budget()

    # TODO(synk): the PyTorch forward has a no-bias branch (bias.nelement() == 0);
    # this kernel implements only the bias-present path (pass bias = zeros to match).
    # TODO(synk): add a D grid axis (last, "arbitrary") with a VMEM accumulator only
    # if 8 * round_up(D,128) * 4 bytes ever exceeds the per-tile budget (D >~ 100K).
    out = pl.pallas_call(
        _lin_unknown_var_kernel,
        out_shape=jax.ShapeDtypeStruct((n, 1), x.dtype),
        grid_spec=pltpu.PrefetchScalarGridSpec(
            num_scalar_prefetch=0,
            grid=grid,
            in_specs=[
                pl.BlockSpec((tile_n, d), lambda i: (i, 0)),        # x tiles: pipelined
                pl.BlockSpec((1, d), lambda i: (0, 0)),             # v row: same block every step
                pl.BlockSpec(memory_space=pltpu.MemorySpace.SMEM),  # lambda_ scalar
                pl.BlockSpec(memory_space=pltpu.MemorySpace.SMEM),  # bias scalar
            ],
            out_specs=pl.BlockSpec((tile_n, 1), lambda i: (i, 0)),
        ),
        compiler_params=pltpu.CompilerParams(
            # Independent N tiles -> lets v7x's two TensorCores split the grid.
            dimension_semantics=("parallel",),
            vmem_limit_bytes=vmem_limit),
        cost_estimate=pl.CostEstimate(
            flops=2 * n * d,
            transcendentals=0,
            bytes_accessed=x.dtype.itemsize * (n * d + d + n) + 8),
    )(x, v_row, lambda_, bias)
    return out


def _reference(x, v, lambda_, bias):
    var = 1.0 / lambda_[0, 0]
    return x @ (v * var) + bias * var


if __name__ == "__main__":
    key = jax.random.PRNGKey(0)
    kx, kv, kl, kb, kx2 = jax.random.split(key, 5)

    N, D = 16, 32                                # small shapes: batch=16, hidden=32
    x = jax.random.normal(kx, (N, D), dtype=jnp.float32)
    v = jax.random.normal(kv, (D, 1), dtype=jnp.float32)
    lambda_ = jnp.abs(jax.random.normal(kl, (1, 1), dtype=jnp.float32)) + 0.5
    bias = jax.random.normal(kb, (1, 1), dtype=jnp.float32)

    out = linear_unknown_variance(x, v, lambda_, bias)
    out = jax.block_until_ready(out)

    ref = _reference(x, v, lambda_, bias)
    assert out.shape == (N, 1)
    assert jnp.allclose(out, ref, atol=1e-5, rtol=1e-5), "mismatch vs reference"

    # Ragged-N path: N not a multiple of tile_n exercises the OOB-masked last block
    # that replaced the jnp.pad copy.
    N2 = 20
    x2 = jax.random.normal(kx2, (N2, D), dtype=jnp.float32)
    out2 = jax.block_until_ready(linear_unknown_variance(x2, v, lambda_, bias, tile_n=8))
    ref2 = _reference(x2, v, lambda_, bias)
    assert out2.shape == (N2, 1)
    assert jnp.allclose(out2, ref2, atol=1e-5, rtol=1e-5), "ragged-N mismatch vs reference"

    print("KERNEL_OK")
</pallas_src>

<mosaic_0001>
module attributes {stable_mosaic.version = 11 : i64} {
  func.func @_lin_unknown_var_kernel(%arg0: i32, %arg1: memref<8x32xf32, #tpu.memory_space<vmem>>, %arg2: memref<1x32xf32, #tpu.memory_space<vmem>>, %arg3: memref<1x1xf32, #tpu.memory_space<smem>>, %arg4: memref<1x1xf32, #tpu.memory_space<smem>>, %arg5: memref<8x1xf32, #tpu.memory_space<vmem>>) attributes {dimension_semantics = [#tpu.dimension_semantics<parallel>], iteration_bounds = array<i64: 2>, scalar_prefetch = 0 : i64, scratch_operands = 0 : i64, tpu.core_type = #tpu.core_type<tc>, window_params = [{transform_indices = @transform_0, window_bounds = array<i64: 8, 32>}, {pipeline_mode = #tpu.pipeline_mode<synchronous>, transform_indices = @transform_1, window_bounds = array<i64: 1, 32>}, {transform_indices = @transform_2, window_bounds = array<i64: 1, 1>}, {transform_indices = @transform_3, window_bounds = array<i64: 1, 1>}, {transform_indices = @transform_4, window_bounds = array<i64: 8, 1>}]} {
    %c0 = arith.constant 0 : index
    %c0_0 = arith.constant 0 : index
    %0 = memref.load %arg3[%c0, %c0_0] : memref<1x1xf32, #tpu.memory_space<smem>>
    %cst = arith.constant 1.000000e+00 : f32
    %1 = arith.divf %cst, %0 : f32
    %c0_1 = arith.constant 0 : index
    %c0_2 = arith.constant 0 : index
    %2 = vector.load %arg2[%c0_1, %c0_2] : memref<1x32xf32, #tpu.memory_space<vmem>>, vector<1x32xf32>
    %3 = vector.broadcast %1 : f32 to vector<1x32xf32>
    %4 = arith.mulf %2, %3 : vector<1x32xf32>
    %c0_3 = arith.constant 0 : index
    %c0_4 = arith.constant 0 : index
    %5 = vector.load %arg1[%c0_3, %c0_4] : memref<8x32xf32, #tpu.memory_space<vmem>>, vector<8x32xf32>
    %6 = vector.broadcast %4 : vector<1x32xf32> to vector<8x32xf32>
    %7 = arith.mulf %5, %6 : vector<8x32xf32>
    %cst_5 = arith.constant dense<0.000000e+00> : vector<8xf32>
    %8 = vector.multi_reduction <add>, %7, %cst_5 [1] : vector<8x32xf32> to vector<8xf32>
    %9 = vector.shape_cast %8 : vector<8xf32> to vector<8x1xf32>
    %c0_6 = arith.constant 0 : index
    %c0_7 = arith.constant 0 : index
    %10 = memref.load %arg4[%c0_6, %c0_7] : memref<1x1xf32, #tpu.memory_space<smem>>
    %11 = arith.mulf %10, %1 : f32
    %12 = vector.broadcast %11 : f32 to vector<8x1xf32>
    %13 = arith.addf %9, %12 : vector<8x1xf32>
    %c0_8 = arith.constant 0 : index
    %c0_9 = arith.constant 0 : index
    %14 = vector.load %arg5[%c0_8, %c0_9] : memref<8x1xf32, #tpu.memory_space<vmem>>, vector<8x1xf32>
    tpu.vector_store %arg5[%c0_8, %c0_9], %13 {strides = array<i32>} : memref<8x1xf32, #tpu.memory_space<vmem>>, vector<8x1xf32>,
    return
  }
  func.func @transform_0(%arg0: i32) -> (i32, i32) {
    %c0_i32 = arith.constant 0 : i32
    %c0_i32_0 = arith.constant 0 : i32
    return %arg0, %c0_i32 : i32, i32
  }
  func.func @transform_1(%arg0: i32) -> (i32, i32) {
    %c0_i32 = arith.constant 0 : i32
    %c0_i32_0 = arith.constant 0 : i32
    %c0_i32_1 = arith.constant 0 : i32
    return %c0_i32, %c0_i32_0 : i32, i32
  }
  func.func @transform_2(%arg0: i32) -> (i32, i32) {
    %c0_i32 = arith.constant 0 : i32
    %c0_i32_0 = arith.constant 0 : i32
    %c0_i32_1 = arith.constant 0 : i32
    return %c0_i32, %c0_i32_0 : i32, i32
  }
  func.func @transform_3(%arg0: i32) -> (i32, i32) {
    %c0_i32 = arith.constant 0 : i32
    %c0_i32_0 = arith.constant 0 : i32
    %c0_i32_1 = arith.constant 0 : i32
    return %c0_i32, %c0_i32_0 : i32, i32
  }
  func.func @transform_4(%arg0: i32) -> (i32, i32) {
    %c0_i32 = arith.constant 0 : i32
    %c0_i32_0 = arith.constant 0 : i32
    return %arg0, %c0_i32 : i32, i32
  }
}

</mosaic_0001>

<bundles_post_ra>
// kernel: tpu_custom_call.1
= control target key start
LH: loop header
LB: loop body
LE: loop exit
PB: predicated region body
PF: predicated region fallthrough
CT: control target
= control target key end

     0   :  { %s566_s0 = inlined_call_operand.hbm [shape: f32[16,32], index: 0, kind: input, shape index: {}]   ;;  %s567_s1 = inlined_call_operand.vmem [shape: f32[1,32], index: 1, kind: input, shape index: {}]   ;;  %s568_s2 = inlined_call_operand.<no memory space> [shape: f32[1,1], index: 2, kind: input, shape index: {}]   ;;  %s569_s3 = inlined_call_operand.<no memory space> [shape: f32[1,1], index: 3, kind: input, shape index: {}]   ;;  %s570_s4 = inlined_call_operand.vmem [shape: f32[16,1], index: 4, kind: output, shape index: {}]  }
   0x1   :  { %9 = sst [smem:[#allocation2]] %s568_s2 }
   0x2   :  { %10 = sst [smem:[#allocation3]] %s569_s3 }
   0x3   :  { %11 = vsyncpa [#allocation5], 0 }
   0x4   :  { %13 = vsyncpa [#allocation5 + $0x1], 0  ;;  %s456_s19 = smov 0   ;;  %s458_s20 = smov 0  }
   0x5   :  { %s460_s21 = smov 0   ;;  %s462_s22 = smov 0  }
   0x6 LB: > { %s475_s2 = sadd.s32 4294967295, %s422_s22   ;;  %s478_s3 = sadd.s32 1, %s422_s22   ;;  %s422_s22 = sphi %s462_s22, %s578_s22   ;;  %s418_s21 = sphi %s460_s21, %s577_s21   ;;  %s414_s20 = sphi %s458_s20, %s576_s20   ;;  %s410_s19 = sphi %s456_s19, %s575_s19  }
   0x7   : > { %s23_s23 = ssub.s32 %s422_s22, %s478_s3  ;;  %s26_s24 = sadd.s32 1, %s418_s21 }
   0x8   : > { %p24_p0 = scmp.eq.s32.totalorder %s23_s23, 0  ;;  %p33_p1 = scmp.ne.s32.totalorder %s418_s21, %s414_s20 }
   0x9   : > { %p34_p2 = scmp.eq.s32.totalorder %s422_s22, 0  ;;  %p39_p3 = scmp.ne.s32.totalorder %s414_s20, %s410_s19 }
   0xa   : > { %s488_s25 = scalar_select %p24_p0, %s418_s21, %s26_s24  }
   0xb   : > { %p35_p4 = por %p34_p2, %p33_p1  ;;  %p40_p5 = scmp.eq.s32.totalorder %s475_s2, 0 }
   0xc   : > { %p323_p6 = scmp.lt.s32.totalorder %s422_s22, 2  ;;  %s161_s27 = sand.u32 1, %s418_s21  }
   0xd   : > { %p492_p7 = por %p40_p5, %p39_p3  ;;  %s308_s28 = sshll.u32 %s161_s27, 3 }
   0xe   : > { %s309_s29 = sshll.u32 %s422_s22, 7  ;;  %s165_s7 = scalar_lea.vmem [#allocation4], %s308_s28 }
   0xf   : > { %s501_s6 = scalar_lea.hbm %s566_s0, %s309_s29  ;;  %s172_s8 = sshll.u32 %s165_s7, 4  ;;  %s503_s8 = int_to_ptr.vmem [resolvable:$true] %s172_s8 }
  0x10   : > { %p505_p8 = pnand %p323_p6, %p35_p4  ;;  %s162_s10 = scalar_lea.sflag [#allocation5], %s161_s27 }
  0x11   : > { %s358_s11 = scalar_lea.hbm %s501_s6, 128  ;;  %s363_s14 = scalar_lea.hbm %s566_s0, 256 }
  0x12   : > { %p359_p11 = scmp.ne.s32.totalorder %s501_s6, %s358_s11  ;;  %p360_p12 = pneg %p505_p8 }
  0x13   : > { %p364_p1 = scmp.lt.u32.totalorder %s501_s6, %s566_s0  ;;  %p365_p2 = scmp.lt.u32.totalorder %s363_s14, %s358_s11 }
  0x14   : > { %p361_p13 = pnand %p360_p12, %p359_p11  ;;  %p367_p4 = scmp.lt.u32.totalorder %s358_s11, %s501_s6 }
  0x15   : > { %p366_p3 = por %p365_p2, %p364_p1 }
  0x16   : > { %p362_p0 = pneg %p361_p13 }
  0x17   : > { %p368_p5 = por %p367_p4, %p366_p3 }
  0x19   : > { %p369_p6 = pnand %p368_p5, %p362_p0 }
  0x1b   : > { %372 = shalt.err (!%p369_p6)
}
  0x1c   : > { %s373_s17 = scalar_lea.vmem %s503_s8, 128  ;;  %s424_s18 = smov [#allocation4]  }
  0x1d   : > { %p374_p11 = scmp.ne.s32.totalorder %s503_s8, %s373_s17  ;;  %s378_s19 = sshll.u32 %s424_s18, 4  ;;  %s379_s19 = int_to_ptr.vmem [resolvable:$false] %s378_s19 }
  0x1e   : > { %s380_s23 = scalar_lea.vmem %s379_s19, 256  ;;  %p381_p10 = scmp.lt.s32.totalorder %s503_s8, %s379_s19 }
  0x1f   : > { %p376_p13 = pnand %p374_p11, %p360_p12  ;;  %p382_p1 = scmp.lt.s32.totalorder %s380_s23, %s373_s17 }
  0x21   : > { %p377_p9 = pneg %p376_p13  ;;  %p383_p2 = por %p382_p1, %p381_p10 }
  0x23   : > { %p384_p3 = pnand %p383_p2, %p377_p9 }
  0x25   : > { %387 = shalt.err (!%p384_p3)
}
  0x26   : > { %322 = dma.hbm_to_vmem [thread:$0]  (!%p505_p8), %s501_s6, 128, %s503_s8, %s162_s10  }
  0x27   : > { %p573_p0 = scmp.lt.s32.totalorder %s422_s22, 3  ;;  %p574_p4 = scmp.ge.s32.totalorder %s422_s22, 1 }
  0x29   : > { %p178_p12 = pnand %p574_p4, %p573_p0 }
  0x2a   : > { %s183_s24 = sand.u32 (!%p178_p12), 1, %s414_s20  }
  0x2b   : > { %181 = sbr.rel (%p178_p12) target bundleno = 272 (0x110), region = 36  ;;  %s311_s27 = sshll.u32 (!%p178_p12), %s183_s24, 3 }
  0x2c   : > { %s184_s28 = scalar_lea.sflag (!%p178_p12), [#allocation5], %s183_s24  ;;  %s187_s29 = scalar_lea.vmem (!%p178_p12), [#allocation4], %s311_s27 }
  0x32   : > { %405 = dma.done.wait (%p492_p7), %s184_s28, 128  }
  0x33   : > { %407 = vsyncadd (%p492_p7), %s184_s28, 4294967168  ;;  %s215_s30 = sld [smem:[#allocation2]]  ;;  %v224_v2 = vlaneseq  ;;  %v219_v4 = vld [vmem:[%s567_s1] sm:$0x1]  ;;  %vm230_vm0 = vcmask 261120   ;;  %p211_p7 = scmp.lt.s32.totalorder %s475_s2, 1 }
  0x34   : > { %v222_v8 = vld [vmem:[%s187_s29] sm:$0xff]  ;;  %s234_s26 = sld [smem:[#allocation3]]  ;;  %vm238_vm1 = vcmask 7168  }
  0x35   : > { %v225_v3 = vshrl.u32 %v224_v2, 7  ;;  %s580_s2 = smov (!%p211_p7, %s475_s2), 1 }
  0x36   : > { %s312_s8 = sshll.u32 %s580_s2, 3 }
  0x37   : > { %v226_v5 = vsub.s32 0, %v225_v3  ;;  %s214_s11 = scalar_lea.vmem %s570_s4, %s312_s8 }
  0x39   : > { %v216_v0 = vstv %s215_s30 }
  0x3a   : > { %356 = vrcp.f32 %v216_v0 }
  0x44   : > { %v357_v1 = vpop.eup %356 }
  0x45   : > { %315 = vpush %v357_v1 }
  0x76   : > { %s316_s6 = spop %315 }
  0x77   : > { %v220_v6 = vstv %s316_s6  ;;  %s235_s7 = smul.f32 %s316_s6, %s234_s26 }
  0x78   : > { %v221_v7 = vmul.f32 %v220_v6, %v219_v4 }
  0x79   : > { %v236_v12 = vstv %s235_s7 }
  0x7a   : > { %v227_v9 = vrot.slane %v221_v7, %v226_v5 }
  0x7c   : > { %v229_v10 = vmul.f32 %v227_v9, %v222_v8 }
  0x7e   : > { %v231_v11 = vsel %vm230_vm0, %v229_v10, 0.0 }
  0x7f   : > { %232 = vadd.xlane.f32.xlu0 %v231_v11 }
 0x10c   : > { %v233_v13 = vpop.xlane.xlu0 %232 }
 0x10d   : > { %v237_v14 = vadd.f32 %v236_v12, %v233_v13 }
 0x10f   : > { %239 = vst.msk [vmem:[%s214_s11] sm:$0xff] %vm238_vm1, %v237_v14 }
 0x110 PF: > { %p16_p8 = scmp.ge.s32.totalorder %s478_s3, 4   ;;  %s575_s19 = smov %s414_s20 }
 0x111   : > { %s576_s20 = smov %s418_s21  ;;  %s577_s21 = smov %s488_s25 }
 0x112   : > { %s578_s22 = smov %s478_s3  ;;  %18 = sbr.rel (!%p16_p8) target bundleno = 6 (0x6), region = 76 }
 0x119   :  { %259 = vsyncpa [#allocation5], 1 }
 0x11a   :  { %261 = vsyncpa [#allocation5 + $0x1], 1 }

</bundles_post_ra>
